<compile_context>
chip_gen: v7x
topology: tpu7x:2x2x1
jax: 0.10.0
libtpu: 0.0.40
codegen_flags: <defaults>
</compile_context>

<pallas_src>
import jax
import jax.numpy as jnp
import numpy as np
from jax.experimental import pallas as pl
from jax.experimental.pallas import tpu as pltpu


_UNROLL_T_MAX = 16  # fully unroll the recurrence for T <= this


def vad_kernel(x_ref, wih_ref, whh_ref, b_ref, wfc_ref, bfc_ref, out_ref):
    # x_ref  : (T, Bp, I)   wih_ref : (I, 4H)   whh_ref : (H, 4H)   b_ref : (1, 4H)
    # wfc_ref: (C, H)       bfc_ref : (1, C)    out_ref : (Bp, C)
    T, Bp, _ = x_ref.shape
    H = whh_ref.shape[0]
    C = wfc_ref.shape[0]

    wih = wih_ref[...]                 # (I, 4H)  (mxu_dtype)
    whh = whh_ref[...]                 # (H, 4H)  (mxu_dtype)
    bias = b_ref[...]                  # (1, 4H)  f32

    def step(h, c, xw_t):
        # True serial dependence: the recurrent matmul of step t+1 cannot be
        # issued before h_t exists; only the x-projections overlap with it.
        gates = xw_t + jnp.dot(h.astype(whh.dtype), whh,
                               preferred_element_type=jnp.float32)   # (Bp, 4H)
        # Two full-(Bp,4H) transcendental passes, gates sliced afterwards.
        sig = jax.nn.sigmoid(gates)
        th = jnp.tanh(gates)
        i_g = sig[:, 0 * H:1 * H]
        f_g = sig[:, 1 * H:2 * H]
        g_g = th[:, 2 * H:3 * H]
        o_g = sig[:, 3 * H:4 * H]
        c_new = f_g * c + i_g * g_g
        h_new = o_g * jnp.tanh(c_new)
        return h_new, c_new

    # h / c carried as values (vreg-resident): no per-step VMEM scratch traffic.
    h = jnp.zeros((Bp, H), jnp.float32)
    c = jnp.zeros((Bp, H), jnp.float32)

    if T <= _UNROLL_T_MAX:
        # Fully unrolled: x_ref[t] is a free leading-axis tile pick; the T
        # independent input-projection matmuls can be scheduled under the
        # serial recurrence chain.
        for t in range(T):
            xw_t = jnp.dot(x_ref[t].astype(wih.dtype), wih,
                           preferred_element_type=jnp.float32) + bias
            h, c = step(h, c, xw_t)
    else:
        # Larger T: one hoisted 3-D contraction keeping time leading (no
        # reshape, no strided per-step slice), then a rolled loop with modest
        # unroll to bound vreg pressure / code size.
        xw = jax.lax.dot_general(
            x_ref[...].astype(wih.dtype), wih,
            dimension_numbers=(((2,), (0,)), ((), ())),
            preferred_element_type=jnp.float32) + bias            # (T, Bp, 4H)

        def body(t, carry):
            h_t, c_t = carry
            xw_t = jax.lax.dynamic_index_in_dim(xw, t, axis=0, keepdims=False)
            return step(h_t, c_t, xw_t)

        h, c = jax.lax.fori_loop(0, T, body, (h, c), unroll=4)

    # Linear head on the final hidden state.
    if C == 1:
        # VPU multiply + XLU cross-lane reduce; avoids a 1-column MXU matmul
        # (full MXU pass + result-FIFO drain) at the very end of the chain.
        out_ref[...] = (jnp.sum(h * wfc_ref[...], axis=-1, keepdims=True)
                        + bfc_ref[...])
    else:
        out_ref[...] = (jax.lax.dot_general(
            h.astype(wfc_ref.dtype), wfc_ref[...],
            dimension_numbers=(((1,), (1,)), ((), ())),
            preferred_element_type=jnp.float32) + bfc_ref[...])


def vad_forward(x_btf, w_ih, w_hh, b_ih, b_hh, w_fc, b_fc, *,
                mxu_dtype=jnp.float32):
    """Forward pass of the VAD module.

    x_btf : (B, T, input_size) float32, batch_first like the PyTorch module.
    w_ih  : (4H, I)   w_hh : (4H, H)   b_ih/b_hh : (4H,)   (PyTorch layouts)
    w_fc  : (C, H)    b_fc : (C,)
    mxu_dtype: dtype fed to the MXU (use jnp.bfloat16 on v6e/v7x; elementwise
               math stays f32 regardless).
    """
    B, T, I = x_btf.shape
    H = w_hh.shape[1]
    C = w_fc.shape[0]

    # Eval-mode dropout is the identity (see TODO at top).
    x_tbf = jnp.transpose(x_btf, (1, 0, 2))            # time-major (T, B, I)

    # Pad batch to a multiple of 8 sublanes so elementwise ops use whole
    # sublanes; padded rows produce garbage that is sliced off below.
    Bp = ((B + 7) // 8) * 8
    if Bp != B:
        x_tbf = jnp.pad(x_tbf, ((0, 0), (0, Bp - B), (0, 0)))

    # Pre-transpose weights / fuse biases for the kernel.
    w_ih_t = w_ih.T.astype(mxu_dtype)                  # (I, 4H)
    w_hh_t = w_hh.T.astype(mxu_dtype)                  # (H, 4H)
    b = (b_ih + b_hh).reshape(1, 4 * H).astype(jnp.float32)
    w_fc_k = w_fc.astype(jnp.float32)                  # (C, H), VPU head stays f32
    b_fc_2d = b_fc.reshape(1, C).astype(jnp.float32)
    x_in = x_tbf.astype(mxu_dtype)

    # NOTE: at these toy shapes everything (x, weights, state) fits trivially
    # in VMEM, so a gridless whole-array-resident call is optimal. At realistic
    # sizes: chunk T behind a grid axis marked "arbitrary" (or emit_pipeline)
    # with h/c carried in VMEM scratch and set vmem_limit_bytes explicitly
    # (v7x has 64 MiB physical / 32 MiB default scoped VMEM), and tile B across
    # a leading "parallel" grid axis to use both v7x TensorCores.
    vmem = pl.BlockSpec(memory_space=pltpu.MemorySpace.VMEM)
    out = pl.pallas_call(
        vad_kernel,
        out_shape=jax.ShapeDtypeStruct((Bp, C), jnp.float32),
        in_specs=[vmem] * 6,
        out_specs=vmem,
    )(x_in, w_ih_t, w_hh_t, b, w_fc_k, b_fc_2d)
    return out[:B]


def _reference(x_btf, w_ih, w_hh, b_ih, b_hh, w_fc, b_fc):
    """Pure-JAX LSTM + Linear reference (PyTorch semantics) for verification."""
    B, T, _ = x_btf.shape
    H = w_hh.shape[1]
    h = jnp.zeros((B, H), jnp.float32)
    c = jnp.zeros((B, H), jnp.float32)
    b = b_ih + b_hh
    for t in range(T):
        gates = x_btf[:, t, :] @ w_ih.T + h @ w_hh.T + b
        i_g = jax.nn.sigmoid(gates[:, 0 * H:1 * H])
        f_g = jax.nn.sigmoid(gates[:, 1 * H:2 * H])
        g_g = jnp.tanh(gates[:, 2 * H:3 * H])
        o_g = jax.nn.sigmoid(gates[:, 3 * H:4 * H])
        c = f_g * c + i_g * g_g
        h = o_g * jnp.tanh(c)
    return h @ w_fc.T + b_fc


if __name__ == "__main__":
    # Small shapes consistent with the module's forward.
    B, T, I, H, C = 2, 8, 16, 32, 1

    key = jax.random.PRNGKey(0)
    kx, k1, k2, k3, k4, k5, k6 = jax.random.split(key, 7)

    # Deterministic PyTorch-style initialization: U(-1/sqrt(H), 1/sqrt(H)).
    klstm = 1.0 / np.sqrt(H)
    w_ih = jax.random.uniform(k1, (4 * H, I), jnp.float32, -klstm, klstm)
    w_hh = jax.random.uniform(k2, (4 * H, H), jnp.float32, -klstm, klstm)
    b_ih = jax.random.uniform(k3, (4 * H,), jnp.float32, -klstm, klstm)
    b_hh = jax.random.uniform(k4, (4 * H,), jnp.float32, -klstm, klstm)
    kfc = 1.0 / np.sqrt(H)
    w_fc = jax.random.uniform(k5, (C, H), jnp.float32, -kfc, kfc)
    b_fc = jax.random.uniform(k6, (C,), jnp.float32, -kfc, kfc)

    x = jax.random.normal(kx, (B, T, I), jnp.float32)   # batch_first input

    out = vad_forward(x, w_ih, w_hh, b_ih, b_hh, w_fc, b_fc)
    out = jax.block_until_ready(out)

    ref = _reference(x, w_ih, w_hh, b_ih, b_hh, w_fc, b_fc)
    assert out.shape == (B, C)
    np.testing.assert_allclose(np.asarray(out), np.asarray(ref),
                               rtol=1e-5, atol=1e-5)
    print("KERNEL_OK")
</pallas_src>

<mosaic_0001>
module attributes {stable_mosaic.version = 11 : i64} {
  func.func @vad_kernel(%arg0: memref<8x8x16xf32, #tpu.memory_space<vmem>>, %arg1: memref<16x128xf32, #tpu.memory_space<vmem>>, %arg2: memref<32x128xf32, #tpu.memory_space<vmem>>, %arg3: memref<1x128xf32, #tpu.memory_space<vmem>>, %arg4: memref<1x32xf32, #tpu.memory_space<vmem>>, %arg5: memref<1x1xf32, #tpu.memory_space<vmem>>, %arg6: memref<8x1xf32, #tpu.memory_space<vmem>>) attributes {dimension_semantics = [], scalar_prefetch = 0 : i64, scratch_operands = 0 : i64, tpu.core_type = #tpu.core_type<tc>} {
    %c0 = arith.constant 0 : index
    %c0_0 = arith.constant 0 : index
    %0 = vector.load %arg1[%c0, %c0_0] : memref<16x128xf32, #tpu.memory_space<vmem>>, vector<16x128xf32>
    %c0_1 = arith.constant 0 : index
    %c0_2 = arith.constant 0 : index
    %1 = vector.load %arg2[%c0_1, %c0_2] : memref<32x128xf32, #tpu.memory_space<vmem>>, vector<32x128xf32>
    %c0_3 = arith.constant 0 : index
    %c0_4 = arith.constant 0 : index
    %2 = vector.load %arg3[%c0_3, %c0_4] : memref<1x128xf32, #tpu.memory_space<vmem>>, vector<1x128xf32>
    %cst = arith.constant 0.000000e+00 : f32
    %3 = vector.broadcast %cst : f32 to vector<8x32xf32>
    %cst_5 = arith.constant 0.000000e+00 : f32
    %4 = vector.broadcast %cst_5 : f32 to vector<8x32xf32>
    %c0_6 = arith.constant 0 : index
    %c0_7 = arith.constant 0 : index
    %c0_8 = arith.constant 0 : index
    %5 = vector.load %arg0[%c0_6, %c0_7, %c0_8] : memref<8x8x16xf32, #tpu.memory_space<vmem>>, vector<1x8x16xf32>
    %6 = vector.shape_cast %5 : vector<1x8x16xf32> to vector<8x16xf32>
    %cst_9 = arith.constant dense<0.000000e+00> : vector<8x128xf32>
    %7 = tpu.matmul %6, %0, %cst_9 {dimension_numbers = #tpu.dot_dimension_numbers<[1], [0], [0], [1], [0, 0, 1, 1], [], []>} : vector<8x16xf32>, vector<16x128xf32>, vector<8x128xf32> -> vector<8x128xf32>
    %8 = vector.broadcast %2 : vector<1x128xf32> to vector<8x128xf32>
    %9 = arith.addf %7, %8 : vector<8x128xf32>
    %cst_10 = arith.constant dense<0.000000e+00> : vector<8x128xf32>
    %10 = tpu.matmul %3, %1, %cst_10 {dimension_numbers = #tpu.dot_dimension_numbers<[1], [0], [0], [1], [0, 0, 1, 1], [], []>} : vector<8x32xf32>, vector<32x128xf32>, vector<8x128xf32> -> vector<8x128xf32>
    %11 = arith.addf %9, %10 : vector<8x128xf32>
    %12 = arith.negf %11 : vector<8x128xf32>
    %13 = math.exp %12 : vector<8x128xf32>
    %cst_11 = arith.constant 1.000000e+00 : f32
    %14 = vector.broadcast %cst_11 : f32 to vector<8x128xf32>
    %15 = arith.addf %14, %13 : vector<8x128xf32>
    %16 = arith.divf %14, %15 : vector<8x128xf32>
    %17 = math.tanh %11 : vector<8x128xf32>
    %18 = vector.extract_strided_slice %16 {offsets = [0, 0], sizes = [8, 32], strides = [1, 1]} : vector<8x128xf32> to vector<8x32xf32>
    %19 = vector.extract_strided_slice %16 {offsets = [0, 32], sizes = [8, 32], strides = [1, 1]} : vector<8x128xf32> to vector<8x32xf32>
    %20 = vector.extract_strided_slice %17 {offsets = [0, 64], sizes = [8, 32], strides = [1, 1]} : vector<8x128xf32> to vector<8x32xf32>
    %21 = vector.extract_strided_slice %16 {offsets = [0, 96], sizes = [8, 32], strides = [1, 1]} : vector<8x128xf32> to vector<8x32xf32>
    %22 = arith.mulf %19, %4 : vector<8x32xf32>
    %23 = arith.mulf %18, %20 : vector<8x32xf32>
    %24 = arith.addf %22, %23 : vector<8x32xf32>
    %25 = math.tanh %24 : vector<8x32xf32>
    %26 = arith.mulf %21, %25 : vector<8x32xf32>
    %c1 = arith.constant 1 : index
    %c0_12 = arith.constant 0 : index
    %c0_13 = arith.constant 0 : index
    %27 = vector.load %arg0[%c1, %c0_12, %c0_13] : memref<8x8x16xf32, #tpu.memory_space<vmem>>, vector<1x8x16xf32>
    %28 = vector.shape_cast %27 : vector<1x8x16xf32> to vector<8x16xf32>
    %cst_14 = arith.constant dense<0.000000e+00> : vector<8x128xf32>
    %29 = tpu.matmul %28, %0, %cst_14 {dimension_numbers = #tpu.dot_dimension_numbers<[1], [0], [0], [1], [0, 0, 1, 1], [], []>} : vector<8x16xf32>, vector<16x128xf32>, vector<8x128xf32> -> vector<8x128xf32>
    %30 = vector.broadcast %2 : vector<1x128xf32> to vector<8x128xf32>
    %31 = arith.addf %29, %30 : vector<8x128xf32>
    %cst_15 = arith.constant dense<0.000000e+00> : vector<8x128xf32>
    %32 = tpu.matmul %26, %1, %cst_15 {dimension_numbers = #tpu.dot_dimension_numbers<[1], [0], [0], [1], [0, 0, 1, 1], [], []>} : vector<8x32xf32>, vector<32x128xf32>, vector<8x128xf32> -> vector<8x128xf32>
    %33 = arith.addf %31, %32 : vector<8x128xf32>
    %34 = arith.negf %33 : vector<8x128xf32>
    %35 = math.exp %34 : vector<8x128xf32>
    %cst_16 = arith.constant 1.000000e+00 : f32
    %36 = vector.broadcast %cst_16 : f32 to vector<8x128xf32>
    %37 = arith.addf %36, %35 : vector<8x128xf32>
    %38 = arith.divf %36, %37 : vector<8x128xf32>
    %39 = math.tanh %33 : vector<8x128xf32>
    %40 = vector.extract_strided_slice %38 {offsets = [0, 0], sizes = [8, 32], strides = [1, 1]} : vector<8x128xf32> to vector<8x32xf32>
    %41 = vector.extract_strided_slice %38 {offsets = [0, 32], sizes = [8, 32], strides = [1, 1]} : vector<8x128xf32> to vector<8x32xf32>
    %42 = vector.extract_strided_slice %39 {offsets = [0, 64], sizes = [8, 32], strides = [1, 1]} : vector<8x128xf32> to vector<8x32xf32>
    %43 = vector.extract_strided_slice %38 {offsets = [0, 96], sizes = [8, 32], strides = [1, 1]} : vector<8x128xf32> to vector<8x32xf32>
    %44 = arith.mulf %41, %24 : vector<8x32xf32>
    %45 = arith.mulf %40, %42 : vector<8x32xf32>
    %46 = arith.addf %44, %45 : vector<8x32xf32>
    %47 = math.tanh %46 : vector<8x32xf32>
    %48 = arith.mulf %43, %47 : vector<8x32xf32>
    %c2 = arith.constant 2 : index
    %c0_17 = arith.constant 0 : index
    %c0_18 = arith.constant 0 : index
    %49 = vector.load %arg0[%c2, %c0_17, %c0_18] : memref<8x8x16xf32, #tpu.memory_space<vmem>>, vector<1x8x16xf32>
    %50 = vector.shape_cast %49 : vector<1x8x16xf32> to vector<8x16xf32>
    %cst_19 = arith.constant dense<0.000000e+00> : vector<8x128xf32>
    %51 = tpu.matmul %50, %0, %cst_19 {dimension_numbers = #tpu.dot_dimension_numbers<[1], [0], [0], [1], [0, 0, 1, 1], [], []>} : vector<8x16xf32>, vector<16x128xf32>, vector<8x128xf32> -> vector<8x128xf32>
    %52 = vector.broadcast %2 : vector<1x128xf32> to vector<8x128xf32>
    %53 = arith.addf %51, %52 : vector<8x128xf32>
    %cst_20 = arith.constant dense<0.000000e+00> : vector<8x128xf32>
    %54 = tpu.matmul %48, %1, %cst_20 {dimension_numbers = #tpu.dot_dimension_numbers<[1], [0], [0], [1], [0, 0, 1, 1], [], []>} : vector<8x32xf32>, vector<32x128xf32>, vector<8x128xf32> -> vector<8x128xf32>
    %55 = arith.addf %53, %54 : vector<8x128xf32>
    %56 = arith.negf %55 : vector<8x128xf32>
    %57 = math.exp %56 : vector<8x128xf32>
    %cst_21 = arith.constant 1.000000e+00 : f32
    %58 = vector.broadcast %cst_21 : f32 to vector<8x128xf32>
    %59 = arith.addf %58, %57 : vector<8x128xf32>
    %60 = arith.divf %58, %59 : vector<8x128xf32>
    %61 = math.tanh %55 : vector<8x128xf32>
    %62 = vector.extract_strided_slice %60 {offsets = [0, 0], sizes = [8, 32], strides = [1, 1]} : vector<8x128xf32> to vector<8x32xf32>
    %63 = vector.extract_strided_slice %60 {offsets = [0, 32], sizes = [8, 32], strides = [1, 1]} : vector<8x128xf32> to vector<8x32xf32>
    %64 = vector.extract_strided_slice %61 {offsets = [0, 64], sizes = [8, 32], strides = [1, 1]} : vector<8x128xf32> to vector<8x32xf32>
    %65 = vector.extract_strided_slice %60 {offsets = [0, 96], sizes = [8, 32], strides = [1, 1]} : vector<8x128xf32> to vector<8x32xf32>
    %66 = arith.mulf %63, %46 : vector<8x32xf32>
    %67 = arith.mulf %62, %64 : vector<8x32xf32>
    %68 = arith.addf %66, %67 : vector<8x32xf32>
    %69 = math.tanh %68 : vector<8x32xf32>
    %70 = arith.mulf %65, %69 : vector<8x32xf32>
    %c3 = arith.constant 3 : index
    %c0_22 = arith.constant 0 : index
    %c0_23 = arith.constant 0 : index
    %71 = vector.load %arg0[%c3, %c0_22, %c0_23] : memref<8x8x16xf32, #tpu.memory_space<vmem>>, vector<1x8x16xf32>
    %72 = vector.shape_cast %71 : vector<1x8x16xf32> to vector<8x16xf32>
    %cst_24 = arith.constant dense<0.000000e+00> : vector<8x128xf32>
    %73 = tpu.matmul %72, %0, %cst_24 {dimension_numbers = #tpu.dot_dimension_numbers<[1], [0], [0], [1], [0, 0, 1, 1], [], []>} : vector<8x16xf32>, vector<16x128xf32>, vector<8x128xf32> -> vector<8x128xf32>
    %74 = vector.broadcast %2 : vector<1x128xf32> to vector<8x128xf32>
    %75 = arith.addf %73, %74 : vector<8x128xf32>
    %cst_25 = arith.constant dense<0.000000e+00> : vector<8x128xf32>
    %76 = tpu.matmul %70, %1, %cst_25 {dimension_numbers = #tpu.dot_dimension_numbers<[1], [0], [0], [1], [0, 0, 1, 1], [], []>} : vector<8x32xf32>, vector<32x128xf32>, vector<8x128xf32> -> vector<8x128xf32>
    %77 = arith.addf %75, %76 : vector<8x128xf32>
    %78 = arith.negf %77 : vector<8x128xf32>
    %79 = math.exp %78 : vector<8x128xf32>
    %cst_26 = arith.constant 1.000000e+00 : f32
    %80 = vector.broadcast %cst_26 : f32 to vector<8x128xf32>
    %81 = arith.addf %80, %79 : vector<8x128xf32>
    %82 = arith.divf %80, %81 : vector<8x128xf32>
    %83 = math.tanh %77 : vector<8x128xf32>
    %84 = vector.extract_strided_slice %82 {offsets = [0, 0], sizes = [8, 32], strides = [1, 1]} : vector<8x128xf32> to vector<8x32xf32>
    %85 = vector.extract_strided_slice %82 {offsets = [0, 32], sizes = [8, 32], strides = [1, 1]} : vector<8x128xf32> to vector<8x32xf32>
    %86 = vector.extract_strided_slice %83 {offsets = [0, 64], sizes = [8, 32], strides = [1, 1]} : vector<8x128xf32> to vector<8x32xf32>
    %87 = vector.extract_strided_slice %82 {offsets = [0, 96], sizes = [8, 32], strides = [1, 1]} : vector<8x128xf32> to vector<8x32xf32>
    %88 = arith.mulf %85, %68 : vector<8x32xf32>
    %89 = arith.mulf %84, %86 : vector<8x32xf32>
    %90 = arith.addf %88, %89 : vector<8x32xf32>
    %91 = math.tanh %90 : vector<8x32xf32>
    %92 = arith.mulf %87, %91 : vector<8x32xf32>
    %c4 = arith.constant 4 : index
    %c0_27 = arith.constant 0 : index
    %c0_28 = arith.constant 0 : index
    %93 = vector.load %arg0[%c4, %c0_27, %c0_28] : memref<8x8x16xf32, #tpu.memory_space<vmem>>, vector<1x8x16xf32>
    %94 = vector.shape_cast %93 : vector<1x8x16xf32> to vector<8x16xf32>
    %cst_29 = arith.constant dense<0.000000e+00> : vector<8x128xf32>
    %95 = tpu.matmul %94, %0, %cst_29 {dimension_numbers = #tpu.dot_dimension_numbers<[1], [0], [0], [1], [0, 0, 1, 1], [], []>} : vector<8x16xf32>, vector<16x128xf32>, vector<8x128xf32> -> vector<8x128xf32>
    %96 = vector.broadcast %2 : vector<1x128xf32> to vector<8x128xf32>
    %97 = arith.addf %95, %96 : vector<8x128xf32>
    %cst_30 = arith.constant dense<0.000000e+00> : vector<8x128xf32>
    %98 = tpu.matmul %92, %1, %cst_30 {dimension_numbers = #tpu.dot_dimension_numbers<[1], [0], [0], [1], [0, 0, 1, 1], [], []>} : vector<8x32xf32>, vector<32x128xf32>, vector<8x128xf32> -> vector<8x128xf32>
    %99 = arith.addf %97, %98 : vector<8x128xf32>
    %100 = arith.negf %99 : vector<8x128xf32>
    %101 = math.exp %100 : vector<8x128xf32>
    %cst_31 = arith.constant 1.000000e+00 : f32
    %102 = vector.broadcast %cst_31 : f32 to vector<8x128xf32>
    %103 = arith.addf %102, %101 : vector<8x128xf32>
    %104 = arith.divf %102, %103 : vector<8x128xf32>
    %105 = math.tanh %99 : vector<8x128xf32>
    %106 = vector.extract_strided_slice %104 {offsets = [0, 0], sizes = [8, 32], strides = [1, 1]} : vector<8x128xf32> to vector<8x32xf32>
    %107 = vector.extract_strided_slice %104 {offsets = [0, 32], sizes = [8, 32], strides = [1, 1]} : vector<8x128xf32> to vector<8x32xf32>
    %108 = vector.extract_strided_slice %105 {offsets = [0, 64], sizes = [8, 32], strides = [1, 1]} : vector<8x128xf32> to vector<8x32xf32>
    %109 = vector.extract_strided_slice %104 {offsets = [0, 96], sizes = [8, 32], strides = [1, 1]} : vector<8x128xf32> to vector<8x32xf32>
    %110 = arith.mulf %107, %90 : vector<8x32xf32>
    %111 = arith.mulf %106, %108 : vector<8x32xf32>
    %112 = arith.addf %110, %111 : vector<8x32xf32>
    %113 = math.tanh %112 : vector<8x32xf32>
    %114 = arith.mulf %109, %113 : vector<8x32xf32>
    %c5 = arith.constant 5 : index
    %c0_32 = arith.constant 0 : index
    %c0_33 = arith.constant 0 : index
    %115 = vector.load %arg0[%c5, %c0_32, %c0_33] : memref<8x8x16xf32, #tpu.memory_space<vmem>>, vector<1x8x16xf32>
    %116 = vector.shape_cast %115 : vector<1x8x16xf32> to vector<8x16xf32>
    %cst_34 = arith.constant dense<0.000000e+00> : vector<8x128xf32>
    %117 = tpu.matmul %116, %0, %cst_34 {dimension_numbers = #tpu.dot_dimension_numbers<[1], [0], [0], [1], [0, 0, 1, 1], [], []>} : vector<8x16xf32>, vector<16x128xf32>, vector<8x128xf32> -> vector<8x128xf32>
    %118 = vector.broadcast %2 : vector<1x128xf32> to vector<8x128xf32>
    %119 = arith.addf %117, %118 : vector<8x128xf32>
    %cst_35 = arith.constant dense<0.000000e+00> : vector<8x128xf32>
    %120 = tpu.matmul %114, %1, %cst_35 {dimension_numbers = #tpu.dot_dimension_numbers<[1], [0], [0], [1], [0, 0, 1, 1], [], []>} : vector<8x32xf32>, vector<32x128xf32>, vector<8x128xf32> -> vector<8x128xf32>
    %121 = arith.addf %119, %120 : vector<8x128xf32>
    %122 = arith.negf %121 : vector<8x128xf32>
    %123 = math.exp %122 : vector<8x128xf32>
    %cst_36 = arith.constant 1.000000e+00 : f32
    %124 = vector.broadcast %cst_36 : f32 to vector<8x128xf32>
    %125 = arith.addf %124, %123 : vector<8x128xf32>
    %126 = arith.divf %124, %125 : vector<8x128xf32>
    %127 = math.tanh %121 : vector<8x128xf32>
    %128 = vector.extract_strided_slice %126 {offsets = [0, 0], sizes = [8, 32], strides = [1, 1]} : vector<8x128xf32> to vector<8x32xf32>
    %129 = vector.extract_strided_slice %126 {offsets = [0, 32], sizes = [8, 32], strides = [1, 1]} : vector<8x128xf32> to vector<8x32xf32>
    %130 = vector.extract_strided_slice %127 {offsets = [0, 64], sizes = [8, 32], strides = [1, 1]} : vector<8x128xf32> to vector<8x32xf32>
    %131 = vector.extract_strided_slice %126 {offsets = [0, 96], sizes = [8, 32], strides = [1, 1]} : vector<8x128xf32> to vector<8x32xf32>
    %132 = arith.mulf %129, %112 : vector<8x32xf32>
    %133 = arith.mulf %128, %130 : vector<8x32xf32>
    %134 = arith.addf %132, %133 : vector<8x32xf32>
    %135 = math.tanh %134 : vector<8x32xf32>
    %136 = arith.mulf %131, %135 : vector<8x32xf32>
    %c6 = arith.constant 6 : index
    %c0_37 = arith.constant 0 : index
    %c0_38 = arith.constant 0 : index
    %137 = vector.load %arg0[%c6, %c0_37, %c0_38] : memref<8x8x16xf32, #tpu.memory_space<vmem>>, vector<1x8x16xf32>
    %138 = vector.shape_cast %137 : vector<1x8x16xf32> to vector<8x16xf32>
    %cst_39 = arith.constant dense<0.000000e+00> : vector<8x128xf32>
    %139 = tpu.matmul %138, %0, %cst_39 {dimension_numbers = #tpu.dot_dimension_numbers<[1], [0], [0], [1], [0, 0, 1, 1], [], []>} : vector<8x16xf32>, vector<16x128xf32>, vector<8x128xf32> -> vector<8x128xf32>
    %140 = vector.broadcast %2 : vector<1x128xf32> to vector<8x128xf32>
    %141 = arith.addf %139, %140 : vector<8x128xf32>
    %cst_40 = arith.constant dense<0.000000e+00> : vector<8x128xf32>
    %142 = tpu.matmul %136, %1, %cst_40 {dimension_numbers = #tpu.dot_dimension_numbers<[1], [0], [0], [1], [0, 0, 1, 1], [], []>} : vector<8x32xf32>, vector<32x128xf32>, vector<8x128xf32> -> vector<8x128xf32>
    %143 = arith.addf %141, %142 : vector<8x128xf32>
    %144 = arith.negf %143 : vector<8x128xf32>
    %145 = math.exp %144 : vector<8x128xf32>
    %cst_41 = arith.constant 1.000000e+00 : f32
    %146 = vector.broadcast %cst_41 : f32 to vector<8x128xf32>
    %147 = arith.addf %146, %145 : vector<8x128xf32>
    %148 = arith.divf %146, %147 : vector<8x128xf32>
    %149 = math.tanh %143 : vector<8x128xf32>
    %150 = vector.extract_strided_slice %148 {offsets = [0, 0], sizes = [8, 32], strides = [1, 1]} : vector<8x128xf32> to vector<8x32xf32>
    %151 = vector.extract_strided_slice %148 {offsets = [0, 32], sizes = [8, 32], strides = [1, 1]} : vector<8x128xf32> to vector<8x32xf32>
    %152 = vector.extract_strided_slice %149 {offsets = [0, 64], sizes = [8, 32], strides = [1, 1]} : vector<8x128xf32> to vector<8x32xf32>
    %153 = vector.extract_strided_slice %148 {offsets = [0, 96], sizes = [8, 32], strides = [1, 1]} : vector<8x128xf32> to vector<8x32xf32>
    %154 = arith.mulf %151, %134 : vector<8x32xf32>
    %155 = arith.mulf %150, %152 : vector<8x32xf32>
    %156 = arith.addf %154, %155 : vector<8x32xf32>
    %157 = math.tanh %156 : vector<8x32xf32>
    %158 = arith.mulf %153, %157 : vector<8x32xf32>
    %c7 = arith.constant 7 : index
    %c0_42 = arith.constant 0 : index
    %c0_43 = arith.constant 0 : index
    %159 = vector.load %arg0[%c7, %c0_42, %c0_43] : memref<8x8x16xf32, #tpu.memory_space<vmem>>, vector<1x8x16xf32>
    %160 = vector.shape_cast %159 : vector<1x8x16xf32> to vector<8x16xf32>
    %cst_44 = arith.constant dense<0.000000e+00> : vector<8x128xf32>
    %161 = tpu.matmul %160, %0, %cst_44 {dimension_numbers = #tpu.dot_dimension_numbers<[1], [0], [0], [1], [0, 0, 1, 1], [], []>} : vector<8x16xf32>, vector<16x128xf32>, vector<8x128xf32> -> vector<8x128xf32>
    %162 = vector.broadcast %2 : vector<1x128xf32> to vector<8x128xf32>
    %163 = arith.addf %161, %162 : vector<8x128xf32>
    %cst_45 = arith.constant dense<0.000000e+00> : vector<8x128xf32>
    %164 = tpu.matmul %158, %1, %cst_45 {dimension_numbers = #tpu.dot_dimension_numbers<[1], [0], [0], [1], [0, 0, 1, 1], [], []>} : vector<8x32xf32>, vector<32x128xf32>, vector<8x128xf32> -> vector<8x128xf32>
    %165 = arith.addf %163, %164 : vector<8x128xf32>
    %166 = arith.negf %165 : vector<8x128xf32>
    %167 = math.exp %166 : vector<8x128xf32>
    %cst_46 = arith.constant 1.000000e+00 : f32
    %168 = vector.broadcast %cst_46 : f32 to vector<8x128xf32>
    %169 = arith.addf %168, %167 : vector<8x128xf32>
    %170 = arith.divf %168, %169 : vector<8x128xf32>
    %171 = math.tanh %165 : vector<8x128xf32>
    %172 = vector.extract_strided_slice %170 {offsets = [0, 0], sizes = [8, 32], strides = [1, 1]} : vector<8x128xf32> to vector<8x32xf32>
    %173 = vector.extract_strided_slice %170 {offsets = [0, 32], sizes = [8, 32], strides = [1, 1]} : vector<8x128xf32> to vector<8x32xf32>
    %174 = vector.extract_strided_slice %171 {offsets = [0, 64], sizes = [8, 32], strides = [1, 1]} : vector<8x128xf32> to vector<8x32xf32>
    %175 = vector.extract_strided_slice %170 {offsets = [0, 96], sizes = [8, 32], strides = [1, 1]} : vector<8x128xf32> to vector<8x32xf32>
    %176 = arith.mulf %173, %156 : vector<8x32xf32>
    %177 = arith.mulf %172, %174 : vector<8x32xf32>
    %178 = arith.addf %176, %177 : vector<8x32xf32>
    %179 = math.tanh %178 : vector<8x32xf32>
    %180 = arith.mulf %175, %179 : vector<8x32xf32>
    %c0_47 = arith.constant 0 : index
    %c0_48 = arith.constant 0 : index
    %181 = vector.load %arg4[%c0_47, %c0_48] : memref<1x32xf32, #tpu.memory_space<vmem>>, vector<1x32xf32>
    %182 = vector.broadcast %181 : vector<1x32xf32> to vector<8x32xf32>
    %183 = arith.mulf %180, %182 : vector<8x32xf32>
    %cst_49 = arith.constant dense<0.000000e+00> : vector<8xf32>
    %184 = vector.multi_reduction <add>, %183, %cst_49 [1] : vector<8x32xf32> to vector<8xf32>
    %185 = vector.shape_cast %184 : vector<8xf32> to vector<8x1xf32>
    %c0_50 = arith.constant 0 : index
    %c0_51 = arith.constant 0 : index
    %186 = vector.load %arg5[%c0_50, %c0_51] : memref<1x1xf32, #tpu.memory_space<vmem>>, vector<1x1xf32>
    %187 = vector.broadcast %186 : vector<1x1xf32> to vector<8x1xf32>
    %188 = arith.addf %185, %187 : vector<8x1xf32>
    %c0_52 = arith.constant 0 : index
    %c0_53 = arith.constant 0 : index
    %189 = vector.load %arg6[%c0_52, %c0_53] : memref<8x1xf32, #tpu.memory_space<vmem>>, vector<8x1xf32>
    tpu.vector_store %arg6[%c0_52, %c0_53], %188 {strides = array<i32>} : memref<8x1xf32, #tpu.memory_space<vmem>>, vector<8x1xf32>,
    return
  }
}

</mosaic_0001>

<bundles_post_ra>
// kernel: tpu_custom_call.1
= control target key start
LH: loop header
LB: loop body
LE: loop exit
PB: predicated region body
PF: predicated region fallthrough
CT: control target
= control target key end

     0   :  { %s2241_s0 = inlined_call_operand.hbm [shape: f32[8,8,16], index: 0, kind: input, shape index: {}]   ;;  %s2242_s1 = inlined_call_operand.hbm [shape: f32[16,128], index: 1, kind: input, shape index: {}]   ;;  %s2243_s2 = inlined_call_operand.hbm [shape: f32[32,128], index: 2, kind: input, shape index: {}]   ;;  %s2244_s3 = inlined_call_operand.vmem [shape: f32[1,128], index: 3, kind: input, shape index: {}]   ;;  %s2245_s4 = inlined_call_operand.vmem [shape: f32[1,32], index: 4, kind: input, shape index: {}]   ;;  %s2246_s5 = inlined_call_operand.<no memory space> [shape: f32[1,1], index: 5, kind: input, shape index: {}]   ;;  %s2247_s6 = inlined_call_operand.vmem [shape: f32[8,1], index: 6, kind: output, shape index: {}]  }
   0x1   :  { %v11_v0 = vstv %s2246_s5 }
   0x2   :  { %12 = vst [vmem:[#allocation2] sm:$0x1] %v11_v0 }
   0x3   :  { %13 = vsyncpa [#allocation4], 0 }
   0x4   :  { %14 = vsyncpa [#allocation6], 0  ;;  %s1986_s23 = smov [#allocation5]   ;;  %s1987_s25 = smov [#allocation3]  }
   0x5   :  { %s32_s24 = sshll.u32 %s1986_s23, 4  ;;  %s20_s26 = sshll.u32 %s1987_s25, 4  ;;  %s33_s24 = int_to_ptr.vmem [resolvable:$true] %s32_s24  ;;  %s2035_s26 = int_to_ptr.vmem [resolvable:$true] %s20_s26 }
   0x6   :  { %s1916_s29 = scalar_lea.hbm %s2242_s1, 256 }
   0x7   :  { %p1917_p0 = scmp.ne.s32.totalorder %s2242_s1, %s1916_s29  ;;  %p1920_p1 = scmp.lt.u32.totalorder %s1916_s29, %s2242_s1 }
   0x9   :  { %p1922_p2 = pnand %p1920_p1, %p1917_p0 }
   0xb   :  { %1925 = shalt.err (!%p1922_p2)
}
   0xc   :  { %s1926_s9 = scalar_lea.vmem %s33_s24, 256  ;;  %p1931_p4 = scmp.lt.s32.totalorder %s33_s24, %s33_s24 }
   0xd   :  { %p1927_p3 = scmp.ne.s32.totalorder %s33_s24, %s1926_s9  ;;  %p1932_p5 = scmp.lt.s32.totalorder %s1926_s9, %s1926_s9 }
   0xf   :  { %p1933_p6 = por %p1932_p5, %p1931_p4 }
  0x11   :  { %p1934_p7 = pnand %p1933_p6, %p1927_p3 }
  0x13   :  { %1937 = shalt.err (!%p1934_p7)
}
  0x14   :  { %s1988_s10 = smov 128   ;;  %s1989_s11 = smov 8  }
  0x15   :  { %38 = dma.hbm_to_vmem [thread:$0]  %s2242_s1, 256, %s33_s24, [#allocation6], %s1988_s10, %s1988_s10, %s1989_s11  }
  0x16   :  { %s1938_s16 = scalar_lea.hbm %s2241_s0, 1024 }
  0x17   :  { %p1939_p8 = scmp.ne.s32.totalorder %s2241_s0, %s1938_s16  ;;  %p1942_p9 = scmp.lt.u32.totalorder %s1938_s16, %s2241_s0 }
  0x19   :  { %p1944_p10 = pnand %p1942_p9, %p1939_p8 }
  0x1b   :  { %1947 = shalt.err (!%p1944_p10)
}
  0x1c   :  { %s1948_s21 = scalar_lea.vmem %s2035_s26, 1024  ;;  %p1953_p12 = scmp.lt.s32.totalorder %s2035_s26, %s2035_s26 }
  0x1d   :  { %p1949_p11 = scmp.ne.s32.totalorder %s2035_s26, %s1948_s21  ;;  %p1954_p13 = scmp.lt.s32.totalorder %s1948_s21, %s1948_s21 }
  0x1f   :  { %p1955_p0 = por %p1954_p13, %p1953_p12 }
  0x21   :  { %p1956_p1 = pnand %p1955_p0, %p1949_p11 }
  0x23   :  { %1959 = shalt.err (!%p1956_p1)
}
  0x24   :  { %26 = dma.hbm_to_vmem [thread:$0]  %s2241_s0, 1024, %s2035_s26, [#allocation4], %s1988_s10, %s1988_s10, %s1989_s11  }
  0x25   :  { %s1990_s23 = smov [#allocation7]   ;;  %s1960_s28 = scalar_lea.hbm %s2243_s2, 512 }
  0x26   :  { %s44_s24 = sshll.u32 %s1990_s23, 4  ;;  %p1961_p2 = scmp.ne.s32.totalorder %s2243_s2, %s1960_s28  ;;  %s45_s24 = int_to_ptr.vmem [resolvable:$true] %s44_s24 }
  0x27   :  { %p1964_p3 = scmp.lt.u32.totalorder %s1960_s28, %s2243_s2 }
  0x29   :  { %p1966_p4 = pnand %p1964_p3, %p1961_p2 }
  0x2b   :  { %1969 = shalt.err (!%p1966_p4)
}
  0x2c   :  { %s1970_s5 = scalar_lea.vmem %s45_s24, 512  ;;  %p1975_p6 = scmp.lt.s32.totalorder %s45_s24, %s45_s24 }
  0x2d   :  { %p1971_p5 = scmp.ne.s32.totalorder %s45_s24, %s1970_s5  ;;  %p1976_p7 = scmp.lt.s32.totalorder %s1970_s5, %s1970_s5 }
  0x2f   :  { %p1977_p8 = por %p1976_p7, %p1975_p6 }
  0x31   :  { %p1978_p9 = pnand %p1977_p8, %p1971_p5 }
  0x33   :  { %1981 = shalt.err (!%p1978_p9)
}
  0x34   :  { %50 = dma.hbm_to_vmem [thread:$0]  %s2243_s2, 512, %s45_s24, [#allocation6], %s1988_s10, %s1988_s10, %s1989_s11  }
  0x35   :  { %1982 = dma.done.wait [#allocation4], 1024  }
  0x36   :  { %1983 = vsyncadd [#allocation4], 4294966272 }
  0x37   :  { %1984 = dma.done.wait [#allocation6], 768  }
  0x38   :  { %1985 = vsyncadd [#allocation6], 4294966528  ;;  %v1991_v1 = vmov 0.0|0.0   ;;  %vm1992_vm0 = vmmov 0   ;;  %v1993_v2 = vmov 0.0   ;;  %v66_v3 = vld [vmem:[#allocation5] sm:$0xff] }
  0x39   :  { %1745 = vmatprep.subr.bf16.mxu0 %v1991_v1  ;;  %1605 = vmatprep.mubr.msk.f32.mxu0 %vm1992_vm0, %v1993_v2  ;;  %v67_v4 = vld [vmem:[#allocation5 + $0x8] sm:$0xff]  ;;  %v68_v6 = vld [vmem:[#allocation7] sm:$0xff]  ;;  %v69_v7 = vld [vmem:[#allocation7 + $0x8] sm:$0xff]  ;;  %vm80_vm1 = vcmask 130048   ;;  %s1994_s10 = smov 64   ;;  %s1995_s11 = smov 32  }
  0x3a   :  { %1754 = vmatprep.subr.bf16.mxu1 %v1991_v1  ;;  %1623 = vmatprep.mubr.msk.f32.mxu1 %vm1992_vm0, %v1993_v2  ;;  %v2093_v5 = vpack.c.bf16 %v67_v4, %v66_v3  ;;  %v73_v8 = vld [vmem:[#allocation3] sm:$0xff]  ;;  %v2096_v9 = vpack.c.bf16 %v69_v7, %v68_v6  ;;  %v71_v11 = vld [vmem:[#allocation7 + $0x18] sm:$0xff]  ;;  %v2118_v13 = vld [vmem:[%s2244_s3] ss:$0 sm:$0xff]  ;;  %vm154_vm2 = vcmask 261120   ;;  %s1996_s13 = smov 96  }
  0x3b   :  { %v70_v10 = vld [vmem:[#allocation7 + $0x10] sm:$0xff]  ;;  %v254_v27 = vld [vmem:[#allocation3 + $0x8] sm:$0xff]  ;;  %v429_v45 = vld [vmem:[#allocation3 + $0x10] sm:$0xff]  ;;  %vm1503_vm3 = vcmask 7168  }
  0x3c   :  { %1747 = vmatpush3.bf16.msra.mxu0 %v2093_v5  ;;  %1756 = vmatpush3.bf16.msra.mxu1 %v2093_v5  ;;  %v2103_v12 = vpack.c.bf16 %v71_v11, %v70_v10  ;;  %v604_v63 = vld [vmem:[#allocation3 + $0x18] sm:$0xff] }
  0x3d   :  { %1748 = vmatprep.subr.bf16.mxu0 %v1991_v1  ;;  %1757 = vmatprep.subr.bf16.mxu1 %v1991_v1 }
  0x3f   :  { %1606 = vmatmul.mubr.msk.f32.vlgmr.msra.gmra.mrb[0].mxu0 %vm80_vm1, %v73_v8  ;;  %1624 = vmatmul.mubr.msk.f32.vlgmr.msra.gmra.mrb[0].mxu1 %vm80_vm1, %v254_v27 }
  0x40   :  { %1750 = vmatpush3.bf16.msra.mxu0 %v2096_v9  ;;  %1616 = vmatprep.mubr.msk.f32.mxu0 %vm1992_vm0, %v1993_v2 }
  0x41   :  { %1751 = vmatprep.subr.bf16.mxu0 %v1991_v1  ;;  %1759 = vmatpush3.bf16.msra.mxu1 %v2096_v9 }
  0x42   :  { %1634 = vmatprep.mubr.msk.f32.mxu1 %vm1992_vm0, %v1993_v2  ;;  %1760 = vmatprep.subr.bf16.mxu1 %v1991_v1 }
  0x44   :  { %1753 = vmatpush3.bf16.msra.mxu0 %v2103_v12 }
  0x45   :  { %1763 = vmatprep.subr.bf16.mxu0 %v1991_v1  ;;  %1762 = vmatpush3.bf16.msra.mxu1 %v2103_v12 }
  0x46   :  { %1772 = vmatprep.subr.bf16.mxu1 %v1991_v1 }
  0x47   :  { %1617 = vmatmul.mubr.f32.vlgmr.msra.gmra.mrb[0].mxu0 %v1993_v2 }
  0x48   :  { %1765 = vmatpush3.bf16.msra.mxu0 %v2093_v5  ;;  %1641 = vmatprep.mubr.msk.f32.mxu0 %vm1992_vm0, %v1993_v2 }
  0x49   :  { %1766 = vmatprep.subr.bf16.mxu0 %v1991_v1 }
  0x4b   :  { %1642 = vmatmul.mubr.msk.f32.vlgmr.msra.gmra.mrb[2].mxu0 %vm80_vm1, %v429_v45 }
  0x4c   :  { %1768 = vmatpush3.bf16.msra.mxu0 %v2096_v9  ;;  %1652 = vmatprep.mubr.msk.f32.mxu0 %vm1992_vm0, %v1993_v2 }
  0x4d   :  { %1769 = vmatprep.subr.bf16.mxu0 %v1991_v1 }
  0x50   :  { %1771 = vmatpush3.bf16.msra.mxu0 %v2103_v12 }
  0x51   :  { %1781 = vmatprep.subr.bf16.mxu0 %v1991_v1 }
 0x11a   :  { %v224_v14 = vpop.f32.mrb[0].mxu0 }
 0x11b   :  { %v1817_v15 = vadd.f32 %v2118_v13, %v224_v14  ;;  %v1618_v16 = vpop.f32.mrb[1].mxu0 }
 0x11d   :  { %1852 = vtanh.f32 %v1817_v15  ;;  %v1513_v18 = vmul.f32 -1.442695, %v1817_v15 }
 0x11f   :  { %1854 = vpow2.f32 %v1513_v18 }
 0x127   :  { %v1853_v17 = vpop.eup %1852 }
 0x128   :  { %238 = vrot.lane.b32.xlu0 %v1853_v17, %s1994_s10 }
 0x129   :  { %v1855_v19 = vpop.eup %1854 }
 0x12a   :  { %v232_v20 = vadd.f32 1.0, %v1855_v19 }
 0x12c   :  { %1856 = vrcp.f32 %v232_v20 }
 0x136   :  { %v1857_v21 = vpop.eup %1856 }
 0x137   :  { %v236_v24 = vmul.f32 0.0, %v1857_v21 }
 0x19a   :  { %v239_v22 = vpop.permute.xlu0 %238 }
 0x19b   :  { %v241_v23 = vmul.f32 %v1857_v21, %v239_v22 }
 0x19d   :  { %243 = vrot.lane.b32.xlu0 %v241_v23, %s1995_s11  ;;  %v779_v23 = vld [vmem:[#allocation3 + $0x20] sm:$0xff] }
 0x20f   :  { %v244_v25 = vpop.permute.xlu0 %243 }
 0x210   :  { %v246_v26 = vadd.f32 %v244_v25, %v236_v24 }
 0x212   :  { %1858 = vtanh.f32 %v246_v26 }
 0x21c   :  { %v1859_v28 = vpop.eup %1858 }
 0x21d   :  { %249 = vrot.lane.b32.xlu1 %v1859_v28, %s1994_s10 }
 0x28f   :  { %v250_v29 = vpop.permute.xlu1 %249 }
 0x290   :  { %v252_v30 = vmul.f32 %v1857_v21, %v250_v29 }
 0x292   :  { %329 = vrot.lane.b32.xlu1 %v252_v30, %s1995_s11 }
 0x304   :  { %v330_v31 = vpop.permute.xlu1 %329 }
 0x305   :  { %1635 = vmatmul.mubr.msk.f32.vlgmr.msra.gmra.mrb[0].mxu1 %vm154_vm2, %v330_v31 }
 0x306   :  { %1774 = vmatpush3.bf16.msra.mxu1 %v2093_v5  ;;  %1659 = vmatprep.mubr.msk.f32.mxu1 %vm1992_vm0, %v1993_v2 }
 0x307   :  { %1775 = vmatprep.subr.bf16.mxu1 %v1991_v1 }
 0x309   :  { %1660 = vmatmul.mubr.msk.f32.vlgmr.msra.gmra.mrb[2].mxu1 %vm80_vm1, %v604_v63 }
 0x30a   :  { %1777 = vmatpush3.bf16.msra.mxu1 %v2096_v9  ;;  %1670 = vmatprep.mubr.msk.f32.mxu1 %vm1992_vm0, %v1993_v2 }
 0x30b   :  { %1778 = vmatprep.subr.bf16.mxu1 %v1991_v1 }
 0x30e   :  { %1780 = vmatpush3.bf16.msra.mxu1 %v2103_v12 }
 0x30f   :  { %1790 = vmatprep.subr.bf16.mxu1 %v1991_v1 }
 0x3d8   :  { %v399_v32 = vpop.f32.mrb[0].mxu1 }
 0x3d9   :  { %v1818_v33 = vadd.f32 %v2118_v13, %v399_v32  ;;  %v1636_v34 = vpop.f32.mrb[1].mxu1 }
 0x3db   :  { %1860 = vtanh.f32 %v1818_v33  ;;  %v1516_v36 = vmul.f32 -1.442695, %v1818_v33 }
 0x3dd   :  { %1862 = vpow2.f32 %v1516_v36 }
 0x3e5   :  { %v1861_v35 = vpop.eup %1860 }
 0x3e6   :  { %413 = vrot.lane.b32.xlu0 %v1861_v35, %s1994_s10 }
 0x3e7   :  { %v1863_v37 = vpop.eup %1862 }
 0x3e8   :  { %v407_v38 = vadd.f32 1.0, %v1863_v37 }
 0x3ea   :  { %1864 = vrcp.f32 %v407_v38 }
 0x3f4   :  { %v1865_v39 = vpop.eup %1864 }
 0x3f5   :  { %v411_v42 = vmul.f32 %v1865_v39, %v246_v26 }
 0x458   :  { %v414_v40 = vpop.permute.xlu0 %413 }
 0x459   :  { %v416_v41 = vmul.f32 %v1865_v39, %v414_v40 }
 0x45b   :  { %418 = vrot.lane.b32.xlu1 %v416_v41, %s1995_s11  ;;  %v954_v41 = vld [vmem:[#allocation3 + $0x28] sm:$0xff] }
 0x4cd   :  { %v419_v43 = vpop.permute.xlu1 %418 }
 0x4ce   :  { %v421_v44 = vadd.f32 %v419_v43, %v411_v42 }
 0x4d0   :  { %1866 = vtanh.f32 %v421_v44 }
 0x4da   :  { %v1867_v46 = vpop.eup %1866 }
 0x4db   :  { %424 = vrot.lane.b32.xlu0 %v1867_v46, %s1994_s10 }
 0x54d   :  { %v425_v47 = vpop.permute.xlu0 %424 }
 0x54e   :  { %v427_v48 = vmul.f32 %v1865_v39, %v425_v47 }
 0x550   :  { %504 = vrot.lane.b32.xlu1 %v427_v48, %s1995_s11 }
 0x5c2   :  { %v505_v49 = vpop.permute.xlu1 %504 }
 0x5c3   :  { %1653 = vmatmul.mubr.msk.f32.vlgmr.msra.gmra.mrb[2].mxu0 %vm154_vm2, %v505_v49 }
 0x5c4   :  { %1783 = vmatpush3.bf16.msra.mxu0 %v2093_v5  ;;  %1677 = vmatprep.mubr.msk.f32.mxu0 %vm1992_vm0, %v1993_v2 }
 0x5c5   :  { %1784 = vmatprep.subr.bf16.mxu0 %v1991_v1 }
 0x5c7   :  { %1678 = vmatmul.mubr.msk.f32.vlgmr.msra.gmra.mrb[4].mxu0 %vm80_vm1, %v779_v23 }
 0x5c8   :  { %1786 = vmatpush3.bf16.msra.mxu0 %v2096_v9  ;;  %1688 = vmatprep.mubr.msk.f32.mxu0 %vm1992_vm0, %v1993_v2 }
 0x5c9   :  { %1787 = vmatprep.subr.bf16.mxu0 %v1991_v1 }
 0x5cc   :  { %1789 = vmatpush3.bf16.msra.mxu0 %v2103_v12 }
 0x5cd   :  { %1799 = vmatprep.subr.bf16.mxu0 %v1991_v1 }
 0x696   :  { %v574_v50 = vpop.f32.mrb[2].mxu0 }
 0x697   :  { %v1819_v51 = vadd.f32 %v2118_v13, %v574_v50  ;;  %v1654_v52 = vpop.f32.mrb[3].mxu0 }
 0x699   :  { %1868 = vtanh.f32 %v1819_v51  ;;  %v1519_v54 = vmul.f32 -1.442695, %v1819_v51 }
 0x69b   :  { %1870 = vpow2.f32 %v1519_v54 }
 0x6a3   :  { %v1869_v53 = vpop.eup %1868 }
 0x6a4   :  { %588 = vrot.lane.b32.xlu0 %v1869_v53, %s1994_s10 }
 0x6a5   :  { %v1871_v55 = vpop.eup %1870 }
 0x6a6   :  { %v582_v56 = vadd.f32 1.0, %v1871_v55 }
 0x6a8   :  { %1872 = vrcp.f32 %v582_v56 }
 0x6b2   :  { %v1873_v57 = vpop.eup %1872 }
 0x6b3   :  { %v586_v60 = vmul.f32 %v1873_v57, %v421_v44 }
 0x716   :  { %v589_v58 = vpop.permute.xlu0 %588 }
 0x717   :  { %v591_v59 = vmul.f32 %v1873_v57, %v589_v58  ;;  %v1129_v58 = vld [vmem:[#allocation3 + $0x30] sm:$0xff] }
 0x719   :  { %593 = vrot.lane.b32.xlu1 %v591_v59, %s1995_s11 }
 0x78b   :  { %v594_v61 = vpop.permute.xlu1 %593 }
 0x78c   :  { %v596_v62 = vadd.f32 %v594_v61, %v586_v60 }
 0x78e   :  { %1874 = vtanh.f32 %v596_v62 }
 0x798   :  { %v1875_v0 = vpop.eup %1874 }
 0x799   :  { %599 = vrot.lane.b32.xlu0 %v1875_v0, %s1994_s10 }
 0x80b   :  { %v600_v3 = vpop.permute.xlu0 %599 }
 0x80c   :  { %v602_v4 = vmul.f32 %v1873_v57, %v600_v3 }
 0x80e   :  { %679 = vrot.lane.b32.xlu1 %v602_v4, %s1995_s11 }
 0x880   :  { %v680_v6 = vpop.permute.xlu1 %679 }
 0x881   :  { %1671 = vmatmul.mubr.msk.f32.vlgmr.msra.gmra.mrb[2].mxu1 %vm154_vm2, %v680_v6 }
 0x882   :  { %1792 = vmatpush3.bf16.msra.mxu1 %v2093_v5  ;;  %1695 = vmatprep.mubr.msk.f32.mxu1 %vm1992_vm0, %v1993_v2 }
 0x883   :  { %1793 = vmatprep.subr.bf16.mxu1 %v1991_v1 }
 0x885   :  { %1696 = vmatmul.mubr.msk.f32.vlgmr.msra.gmra.mrb[4].mxu1 %vm80_vm1, %v954_v41 }
 0x886   :  { %1795 = vmatpush3.bf16.msra.mxu1 %v2096_v9  ;;  %1706 = vmatprep.mubr.msk.f32.mxu1 %vm1992_vm0, %v1993_v2 }
 0x887   :  { %1796 = vmatprep.subr.bf16.mxu1 %v1991_v1 }
 0x88a   :  { %1798 = vmatpush3.bf16.msra.mxu1 %v2103_v12 }
 0x88b   :  { %1808 = vmatprep.subr.bf16.mxu1 %v1991_v1 }
 0x954   :  { %v749_v7 = vpop.f32.mrb[2].mxu1 }
 0x955   :  { %v1820_v8 = vadd.f32 %v2118_v13, %v749_v7  ;;  %v1672_v10 = vpop.f32.mrb[3].mxu1 }
 0x957   :  { %1876 = vtanh.f32 %v1820_v8  ;;  %v1522_v14 = vmul.f32 -1.442695, %v1820_v8 }
 0x959   :  { %1878 = vpow2.f32 %v1522_v14 }
 0x961   :  { %v1877_v11 = vpop.eup %1876 }
 0x962   :  { %763 = vrot.lane.b32.xlu0 %v1877_v11, %s1994_s10 }
 0x963   :  { %v1879_v15 = vpop.eup %1878 }
 0x964   :  { %v757_v16 = vadd.f32 1.0, %v1879_v15 }
 0x966   :  { %1880 = vrcp.f32 %v757_v16 }
 0x970   :  { %v1881_v17 = vpop.eup %1880 }
 0x971   :  { %v761_v20 = vmul.f32 %v1881_v17, %v596_v62 }
 0x9d4   :  { %v764_v18 = vpop.permute.xlu0 %763 }
 0x9d5   :  { %v766_v19 = vmul.f32 %v1881_v17, %v764_v18  ;;  %v1304_v18 = vld [vmem:[#allocation3 + $0x38] sm:$0xff] }
 0x9d7   :  { %768 = vrot.lane.b32.xlu1 %v766_v19, %s1995_s11 }
 0xa49   :  { %v769_v21 = vpop.permute.xlu1 %768 }
 0xa4a   :  { %v771_v22 = vadd.f32 %v769_v21, %v761_v20 }
 0xa4c   :  { %1882 = vtanh.f32 %v771_v22 }
 0xa56   :  { %v1883_v24 = vpop.eup %1882 }
 0xa57   :  { %774 = vrot.lane.b32.xlu0 %v1883_v24, %s1994_s10 }
 0xac9   :  { %v775_v25 = vpop.permute.xlu0 %774 }
 0xaca   :  { %v777_v26 = vmul.f32 %v1881_v17, %v775_v25 }
 0xacc   :  { %854 = vrot.lane.b32.xlu1 %v777_v26, %s1995_s11 }
 0xb3e   :  { %v855_v27 = vpop.permute.xlu1 %854 }
 0xb3f   :  { %1689 = vmatmul.mubr.msk.f32.vlgmr.msra.gmra.mrb[4].mxu0 %vm154_vm2, %v855_v27 }
 0xb40   :  { %1801 = vmatpush3.bf16.msra.mxu0 %v2093_v5  ;;  %1713 = vmatprep.mubr.msk.f32.mxu0 %vm1992_vm0, %v1993_v2 }
 0xb41   :  { %1802 = vmatprep.subr.bf16.mxu0 %v1991_v1 }
 0xb43   :  { %1714 = vmatmul.mubr.msk.f32.vlgmr.msra.gmra.mrb[6].mxu0 %vm80_vm1, %v1129_v58 }
 0xb44   :  { %1804 = vmatpush3.bf16.msra.mxu0 %v2096_v9  ;;  %1724 = vmatprep.mubr.msk.f32.mxu0 %vm1992_vm0, %v1993_v2 }
 0xb45   :  { %1805 = vmatprep.subr.bf16.mxu0 %v1991_v1 }
 0xb48   :  { %1807 = vmatpush3.bf16.msra.mxu0 %v2103_v12 }
 0xc12   :  { %v924_v28 = vpop.f32.mrb[4].mxu0 }
 0xc13   :  { %v1821_v29 = vadd.f32 %v2118_v13, %v924_v28  ;;  %v1690_v30 = vpop.f32.mrb[5].mxu0 }
 0xc15   :  { %1884 = vtanh.f32 %v1821_v29  ;;  %v1525_v32 = vmul.f32 -1.442695, %v1821_v29  ;;  %v1535_v29 = vld [vmem:[%s2245_s4] ss:$0 sm:$0xff] }
 0xc17   :  { %1886 = vpow2.f32 %v1525_v32 }
 0xc1f   :  { %v1885_v31 = vpop.eup %1884 }
 0xc20   :  { %938 = vrot.lane.b32.xlu0 %v1885_v31, %s1994_s10 }
 0xc21   :  { %v1887_v33 = vpop.eup %1886 }
 0xc22   :  { %v932_v34 = vadd.f32 1.0, %v1887_v33 }
 0xc24   :  { %1888 = vrcp.f32 %v932_v34 }
 0xc2e   :  { %v1889_v35 = vpop.eup %1888 }
 0xc2f   :  { %v936_v38 = vmul.f32 %v1889_v35, %v771_v22 }
 0xc92   :  { %v939_v36 = vpop.permute.xlu0 %938 }
 0xc93   :  { %v941_v37 = vmul.f32 %v1889_v35, %v939_v36 }
 0xc95   :  { %943 = vrot.lane.b32.xlu1 %v941_v37, %s1995_s11 }
 0xd07   :  { %v944_v39 = vpop.permute.xlu1 %943 }
 0xd08   :  { %v946_v40 = vadd.f32 %v944_v39, %v936_v38  ;;  %v1536_v39 = vld [vmem:[#allocation2] ss:$0 sm:$0xff] }
 0xd0a   :  { %1890 = vtanh.f32 %v946_v40 }
 0xd14   :  { %v1891_v42 = vpop.eup %1890 }
 0xd15   :  { %949 = vrot.lane.b32.xlu0 %v1891_v42, %s1994_s10 }
 0xd87   :  { %v950_v43 = vpop.permute.xlu0 %949 }
 0xd88   :  { %v952_v44 = vmul.f32 %v1889_v35, %v950_v43 }
 0xd8a   :  { %1029 = vrot.lane.b32.xlu1 %v952_v44, %s1995_s11 }
 0xdfc   :  { %v1030_v45 = vpop.permute.xlu1 %1029 }
 0xdfd   :  { %1707 = vmatmul.mubr.msk.f32.vlgmr.msra.gmra.mrb[4].mxu1 %vm154_vm2, %v1030_v45 }
 0xdfe   :  { %1810 = vmatpush3.bf16.msra.mxu1 %v2093_v5  ;;  %1731 = vmatprep.mubr.msk.f32.mxu1 %vm1992_vm0, %v1993_v2 }
 0xdff   :  { %1811 = vmatprep.subr.bf16.mxu1 %v1991_v1 }
 0xe01   :  { %1732 = vmatmul.mubr.msk.f32.vlgmr.msra.gmra.mrb[6].mxu1 %vm80_vm1, %v1304_v18 }
 0xe02   :  { %1813 = vmatpush3.bf16.msra.mxu1 %v2096_v9  ;;  %1742 = vmatprep.mubr.msk.f32.mxu1 %vm1992_vm0, %v1993_v2 }
 0xe03   :  { %1814 = vmatprep.subr.bf16.mxu1 %v1991_v1 }
 0xe06   :  { %1816 = vmatpush3.bf16.msra.mxu1 %v2103_v12 }
 0xed0   :  { %v1099_v46 = vpop.f32.mrb[4].mxu1 }
 0xed1   :  { %v1822_v47 = vadd.f32 %v2118_v13, %v1099_v46  ;;  %v1708_v48 = vpop.f32.mrb[5].mxu1 }
 0xed3   :  { %1892 = vtanh.f32 %v1822_v47  ;;  %v1528_v50 = vmul.f32 -1.442695, %v1822_v47 }
 0xed5   :  { %1894 = vpow2.f32 %v1528_v50 }
 0xedd   :  { %v1893_v49 = vpop.eup %1892 }
 0xede   :  { %1113 = vrot.lane.b32.xlu0 %v1893_v49, %s1994_s10 }
 0xedf   :  { %v1895_v51 = vpop.eup %1894 }
 0xee0   :  { %v1107_v52 = vadd.f32 1.0, %v1895_v51 }
 0xee2   :  { %1896 = vrcp.f32 %v1107_v52 }
 0xeec   :  { %v1897_v53 = vpop.eup %1896 }
 0xeed   :  { %v1111_v55 = vmul.f32 %v1897_v53, %v946_v40 }
 0xf50   :  { %v1114_v5 = vpop.permute.xlu0 %1113 }
 0xf51   :  { %v1116_v54 = vmul.f32 %v1897_v53, %v1114_v5 }
 0xf53   :  { %1118 = vrot.lane.b32.xlu1 %v1116_v54, %s1995_s11 }
 0xfc5   :  { %v1119_v56 = vpop.permute.xlu1 %1118 }
 0xfc6   :  { %v1121_v57 = vadd.f32 %v1119_v56, %v1111_v55 }
 0xfc8   :  { %1898 = vtanh.f32 %v1121_v57 }
 0xfd2   :  { %v1899_v59 = vpop.eup %1898 }
 0xfd3   :  { %1124 = vrot.lane.b32.xlu0 %v1899_v59, %s1994_s10 }
0x1045   :  { %v1125_v60 = vpop.permute.xlu0 %1124 }
0x1046   :  { %v1127_v61 = vmul.f32 %v1897_v53, %v1125_v60 }
0x1048   :  { %1204 = vrot.lane.b32.xlu1 %v1127_v61, %s1995_s11 }
0x10ba   :  { %v1205_v62 = vpop.permute.xlu1 %1204 }
0x10bb   :  { %1725 = vmatmul.mubr.msk.f32.vlgmr.msra.gmra.mrb[6].mxu0 %vm154_vm2, %v1205_v62 }
0x118e   :  { %v1274_v63 = vpop.f32.mrb[6].mxu0 }
0x118f   :  { %v1823_v0 = vadd.f32 %v2118_v13, %v1274_v63  ;;  %v1726_v3 = vpop.f32.mrb[7].mxu0 }
0x1191   :  { %1900 = vtanh.f32 %v1823_v0  ;;  %v1531_v6 = vmul.f32 -1.442695, %v1823_v0 }
0x1193   :  { %1902 = vpow2.f32 %v1531_v6 }
0x119b   :  { %v1901_v4 = vpop.eup %1900 }
0x119c   :  { %1288 = vrot.lane.b32.xlu0 %v1901_v4, %s1994_s10 }
0x119d   :  { %v1903_v7 = vpop.eup %1902 }
0x119e   :  { %v1282_v8 = vadd.f32 1.0, %v1903_v7 }
0x11a0   :  { %1904 = vrcp.f32 %v1282_v8 }
0x11aa   :  { %v1905_v10 = vpop.eup %1904 }
0x11ab   :  { %v1286_v15 = vmul.f32 %v1905_v10, %v1121_v57 }
0x120e   :  { %v1289_v11 = vpop.permute.xlu0 %1288 }
0x120f   :  { %v1291_v14 = vmul.f32 %v1905_v10, %v1289_v11 }
0x1211   :  { %1293 = vrot.lane.b32.xlu1 %v1291_v14, %s1995_s11 }
0x1283   :  { %v1294_v16 = vpop.permute.xlu1 %1293 }
0x1284   :  { %v1296_v17 = vadd.f32 %v1294_v16, %v1286_v15 }
0x1286   :  { %1906 = vtanh.f32 %v1296_v17 }
0x1290   :  { %v1907_v19 = vpop.eup %1906 }
0x1291   :  { %1299 = vrot.lane.b32.xlu0 %v1907_v19, %s1994_s10 }
0x1303   :  { %v1300_v20 = vpop.permute.xlu0 %1299 }
0x1304   :  { %v1302_v21 = vmul.f32 %v1905_v10, %v1300_v20 }
0x1306   :  { %1379 = vrot.lane.b32.xlu1 %v1302_v21, %s1995_s11 }
0x1378   :  { %v1380_v22 = vpop.permute.xlu1 %1379 }
0x1379   :  { %1743 = vmatmul.mubr.msk.f32.vlgmr.msra.gmra.mrb[6].mxu1 %vm154_vm2, %v1380_v22 }
0x144c   :  { %v1449_v23 = vpop.f32.mrb[6].mxu1 }
0x144d   :  { %v1824_v9 = vadd.f32 %v2118_v13, %v1449_v23  ;;  %v1744_v24 = vpop.f32.mrb[7].mxu1 }
0x144f   :  { %1908 = vtanh.f32 %v1824_v9  ;;  %v1534_v1 = vmul.f32 -1.442695, %v1824_v9 }
0x1451   :  { %1910 = vpow2.f32 %v1534_v1 }
0x1459   :  { %v1909_v2 = vpop.eup %1908 }
0x145a   :  { %1463 = vrot.lane.b32.xlu0 %v1909_v2, %s1994_s10 }
0x145b   :  { %v1911_v12 = vpop.eup %1910 }
0x145c   :  { %v1457_v25 = vadd.f32 1.0, %v1911_v12 }
0x145e   :  { %1912 = vrcp.f32 %v1457_v25 }
0x1468   :  { %v1913_v26 = vpop.eup %1912 }
0x1469   :  { %v1461_v13 = vmul.f32 %v1913_v26, %v1296_v17 }
0x14cc   :  { %v1464_v27 = vpop.permute.xlu0 %1463 }
0x14cd   :  { %v1466_v28 = vmul.f32 %v1913_v26, %v1464_v27 }
0x14cf   :  { %1468 = vrot.lane.b32.xlu1 %v1466_v28, %s1995_s11 }
0x14d3   :  { %1484 = vrot.lane.b32.xlu1 %v1535_v29, %s1996_s13 }
0x1541   :  { %v1469_v30 = vpop.permute.xlu1 %1468 }
0x1542   :  { %v1471_v31 = vadd.f32 %v1469_v30, %v1461_v13 }
0x1544   :  { %1914 = vtanh.f32 %v1471_v31 }
0x1545   :  { %v1485_v34 = vpop.permute.xlu1 %1484 }
0x154e   :  { %v1915_v32 = vpop.eup %1914 }
0x154f   :  { %1474 = vrot.lane.b32.xlu0 %v1915_v32, %s1994_s10 }
0x15c1   :  { %v1475_v33 = vpop.permute.xlu0 %1474 }
0x15c2   :  { %v1477_v35 = vmul.f32 %v1913_v26, %v1475_v33 }
0x15c4   :  { %v1487_v36 = vmul.f32 %v1485_v34, %v1477_v35 }
0x15c6   :  { %1489 = vrot.lane.b32.xlu0 %v1487_v36, %s1995_s11 }
0x1638   :  { %v1490_v37 = vpop.permute.xlu0 %1489 }
0x1639   :  { %v1492_v38 = vsel %vm154_vm2, %v1490_v37, 0.0 }
0x163a   :  { %1493 = vadd.xlane.f32.xlu1 %v1492_v38 }
0x16c7   :  { %v1494_v40 = vpop.xlane.xlu1 %1493 }
0x16c8   :  { %v1502_v41 = vadd.f32 %v1536_v39, %v1494_v40 }
0x16ca   :  { %1504 = vst.msk [vmem:[%s2247_s6] sm:$0xff] %vm1503_vm3, %v1502_v41 }
0x16cb   :  { %1509 = vsyncpa [#allocation4], 1 }
0x16cc   :  { %1510 = vsyncpa [#allocation6], 1 }

</bundles_post_ra>
